<compile_context>
chip_gen: v7x
topology: tpu7x:2x2x1
jax: 0.10.0
libtpu: 0.0.40
codegen_flags: <defaults>
</compile_context>

<pallas_src>
import math

import jax
import jax.numpy as jnp
from jax.experimental import pallas as pl
from jax.experimental.pallas import tpu as pltpu


# ----------------------------- helpers --------------------------------------

def _cdiv(a, b):
    return (a + b - 1) // b


def _round_up(a, b):
    return _cdiv(a, b) * b


def _device_kind():
    try:
        return jax.devices()[0].device_kind.lower()
    except Exception:
        return ""


def _num_tensorcores(kind):
    # v7x has 2 TensorCores per chip; v5e/v6e have 1.
    return 2 if "v7" in kind else 1


def _vmem_budget_bytes(kind):
    """Per-TC scoped-VMEM budget: physical capacity minus ~18% headroom
    (v7x 64 MiB -> ~52 MiB, v5e/v6e 128 MiB -> ~104 MiB)."""
    cap = 0
    try:
        cap = int(getattr(pltpu.get_tpu_info(), "vmem_capacity_bytes", 0))
    except Exception:
        cap = 0
    if cap <= 0:
        cap = (64 << 20) if "v7" in kind else (128 << 20)
    return (cap * 13) // 16


def _choose_block_batch(B, num_tc, max_rows):
    """Largest batch tile that (a) fits the VMEM row budget, (b) on 2-TC chips
    gives an even number of >=128-row steps when there is enough work, and
    (c) keeps batch-padding waste below ~12.5%."""
    B8 = _round_up(B, 8)
    cap = max(8, min(max_rows, 2048, B8))      # all multiples of 8
    steps = max(1, _cdiv(B8, cap))
    if num_tc >= 2 and B8 >= 2 * 128:
        steps = max(steps, 2)                  # split across the two TCs
    if num_tc >= 2 and steps > 1 and steps % 2:
        steps += 1                             # even split
    bm = min(cap, _round_up(_cdiv(B8, steps), 8))
    # cap padded-row waste at ~1/8 of B (waste only occurs when bm doesn't divide B)
    while bm > 8 and (_round_up(B, bm) - B) * 8 > B:
        steps += 1
        if num_tc >= 2 and steps % 2:
            steps += 1
        bm = min(cap, _round_up(_cdiv(B8, steps), 8))
    return bm


# ------------------------------ kernels -------------------------------------

def _decoder_kernel(x_ref, w1_ref, b1_ref, w2_ref, b2_ref, o_ref):
    # fc1: [bm, in] @ [in, hid_p] -> f32, + bias, ReLU
    h = jnp.dot(x_ref[...], w1_ref[...], preferred_element_type=jnp.float32)
    h = jnp.maximum(h + b1_ref[...], 0.0)
    # fc2: [bm, hid_p] @ [hid_p, out_p] -> f32, + bias
    y = jnp.dot(h.astype(w2_ref.dtype), w2_ref[...],
                preferred_element_type=jnp.float32)
    o_ref[...] = (y + b2_ref[...]).astype(o_ref.dtype)


def _decoder_kernel_ktiled(x_ref, w1_ref, b1_ref, w2_ref, b2_ref, o_ref, acc_ref):
    # hidden dim tiled on grid axis 1 ("arbitrary"); f32 accumulator scratch.
    k = pl.program_id(1)

    @pl.when(k == 0)
    def _init():
        acc_ref[...] = jnp.zeros_like(acc_ref)

    h = jnp.dot(x_ref[...], w1_ref[...], preferred_element_type=jnp.float32)
    h = jnp.maximum(h + b1_ref[...], 0.0)        # ReLU is elementwise over hid -> tiling exact
    acc_ref[...] += jnp.dot(h.astype(w2_ref.dtype), w2_ref[...],
                            preferred_element_type=jnp.float32)

    @pl.when(k == pl.num_programs(1) - 1)
    def _finalize():
        o_ref[...] = (acc_ref[...] + b2_ref[...]).astype(o_ref.dtype)


# ------------------------------ wrapper -------------------------------------

def decoder_forward(x, w1, b1, w2, b2, *, block_batch=None, block_hidden=None,
                    compute_dtype=None):
    """x: [B, in_dim]; w1: [in_dim, hid]; b1: [hid]; w2: [hid, out]; b2: [out]."""
    B, in_dim = x.shape
    hid = w1.shape[1]
    out_dim = w2.shape[1]
    out_dtype = x.dtype

    kind = _device_kind()
    num_tc = _num_tensorcores(kind)
    budget = _vmem_budget_bytes(kind)

    # bf16 compute (native MXU dtype) once the matmuls are large enough to be
    # MXU/HBM-bound; tiny layers stay exact in the input dtype.
    if compute_dtype is None:
        compute_dtype = (jnp.bfloat16
                         if in_dim * hid + hid * out_dim >= (1 << 20)
                         else x.dtype)
    w_itemsize = jnp.dtype(compute_dtype).itemsize
    out_itemsize = jnp.dtype(out_dtype).itemsize

    # lane-dense feature dims: 128 always; 256 for large dims on 256-wide MXUs
    lane_h = 256 if (hid >= 512 and "v5" not in kind) else 128
    lane_o = 256 if (out_dim >= 512 and "v5" not in kind) else 128
    hid_p = _round_up(hid, lane_h)
    out_p = _round_up(out_dim, lane_o)

    # --- path selection: resident weights vs hidden-tiled streaming ----------
    resident_w_bytes = ((in_dim * hid_p + hid_p * out_p) * w_itemsize
                        + (hid_p + out_p) * 4)
    use_ktiled = block_hidden is not None and block_hidden < hid_p
    if not use_ktiled and resident_w_bytes > (budget * 3) // 5:
        use_ktiled = True

    if use_ktiled:
        if block_hidden is None:
            # largest multiple of lane_h keeping double-buffered weight tiles
            # under ~half the VMEM budget
            per_col = max(1, (in_dim + out_p) * w_itemsize * 2)
            block_hidden = max(lane_h, ((budget // 2) // per_col) // lane_h * lane_h)
        block_hidden = max(128, _round_up(block_hidden, 128))
        block_hidden = min(block_hidden, _round_up(hid_p, 128))
        hid_p = _round_up(hid_p, block_hidden)
        fixed = (2 * (in_dim * block_hidden + block_hidden * out_p) * w_itemsize
                 + 2 * block_hidden * 4 + out_p * 4)
        per_row = (2 * in_dim * w_itemsize + 2 * out_p * out_itemsize
                   + (block_hidden + 2 * out_p) * 4)
    else:
        fixed = resident_w_bytes
        per_row = (2 * in_dim * w_itemsize + 2 * out_p * out_itemsize
                   + (hid_p + out_p) * 4)

    # --- weight / bias prep (cast + zero-pad; exact) --------------------------
    x_c = x.astype(compute_dtype)
    w1 = w1.astype(compute_dtype)
    w2 = w2.astype(compute_dtype)
    b1 = b1.astype(jnp.float32)
    b2 = b2.astype(jnp.float32)
    if hid_p != hid:
        w1 = jnp.pad(w1, ((0, 0), (0, hid_p - hid)))
        b1 = jnp.pad(b1, (0, hid_p - hid))
        w2 = jnp.pad(w2, ((0, hid_p - hid), (0, 0)))
    if out_p != out_dim:
        w2 = jnp.pad(w2, ((0, 0), (0, out_p - out_dim)))
        b2 = jnp.pad(b2, (0, out_p - out_dim))
    b1_2d = b1.reshape(1, hid_p)
    b2_2d = b2.reshape(1, out_p)

    # --- batch tiling ----------------------------------------------------------
    avail = budget - fixed - (2 << 20)
    max_rows = max(8, (avail // max(per_row, 1)) // 8 * 8) if avail > 0 else 8
    if block_batch is None:
        block_batch = _choose_block_batch(B, num_tc, max_rows)
    block_batch = max(8, _round_up(block_batch, 8))
    B_p = _round_up(B, block_batch)
    x_p = jnp.pad(x_c, ((0, B_p - B), (0, 0))) if B_p != B else x_c

    needed = fixed + block_batch * per_row
    vmem_limit = int(min(budget, max(needed + needed // 4 + (2 << 20), 32 << 20)))

    flops = 2 * B_p * (in_dim * hid_p + hid_p * out_p)
    bytes_accessed = (B_p * in_dim * w_itemsize
                      + (in_dim * hid_p + hid_p * out_p) * w_itemsize
                      + (hid_p + out_p) * 4
                      + B_p * out_p * out_itemsize)
    cost = pl.CostEstimate(flops=flops, transcendentals=0,
                           bytes_accessed=bytes_accessed)

    if not use_ktiled:
        # resident weights/biases: constant index_map -> single buffer
        def _resident(shape):
            return pl.BlockSpec(shape, lambda i: (0, 0),
                                pipeline_mode=pl.Buffered(1))

        out = pl.pallas_call(
            _decoder_kernel,
            out_shape=jax.ShapeDtypeStruct((B_p, out_p), out_dtype),
            grid_spec=pltpu.PrefetchScalarGridSpec(
                num_scalar_prefetch=0,
                grid=(B_p // block_batch,),
                in_specs=[
                    pl.BlockSpec((block_batch, in_dim), lambda i: (i, 0)),
                    _resident((in_dim, hid_p)),
                    _resident((1, hid_p)),
                    _resident((hid_p, out_p)),
                    _resident((1, out_p)),
                ],
                out_specs=pl.BlockSpec((block_batch, out_p), lambda i: (i, 0)),
            ),
            compiler_params=pltpu.CompilerParams(
                dimension_semantics=("parallel",),
                vmem_limit_bytes=vmem_limit,
            ),
            cost_estimate=cost,
        )(x_p, w1, b1_2d, w2, b2_2d)
    else:
        grid = (B_p // block_batch, hid_p // block_hidden)
        out = pl.pallas_call(
            _decoder_kernel_ktiled,
            out_shape=jax.ShapeDtypeStruct((B_p, out_p), out_dtype),
            grid_spec=pltpu.PrefetchScalarGridSpec(
                num_scalar_prefetch=0,
                grid=grid,
                in_specs=[
                    pl.BlockSpec((block_batch, in_dim), lambda i, k: (i, 0)),
                    pl.BlockSpec((in_dim, block_hidden), lambda i, k: (0, k)),
                    pl.BlockSpec((1, block_hidden), lambda i, k: (0, k)),
                    pl.BlockSpec((block_hidden, out_p), lambda i, k: (k, 0)),
                    pl.BlockSpec((1, out_p), lambda i, k: (0, 0),
                                 pipeline_mode=pl.Buffered(1)),
                ],
                out_specs=pl.BlockSpec((block_batch, out_p), lambda i, k: (i, 0)),
                scratch_shapes=[pltpu.VMEM((block_batch, out_p), jnp.float32)],
            ),
            compiler_params=pltpu.CompilerParams(
                dimension_semantics=("parallel", "arbitrary"),
                vmem_limit_bytes=vmem_limit,
            ),
            cost_estimate=cost,
        )(x_p, w1, b1_2d, w2, b2_2d)

    # TODO(synk): offer a padded-output return for downstream consumers to skip
    # this XLA slice pass when out_dim << 128 and B is very large.
    return out[:B, :out_dim]


# --------------------------- parameter init ---------------------------------

def init_decoder_params(key, input_dim, hidden_dim, output_dim, dtype=jnp.float32):
    """Mirror nn.Linear's default init (uniform +-1/sqrt(fan_in)).
    Weights returned pre-transposed to [in, out]."""
    k1, k2, k3, k4 = jax.random.split(key, 4)
    bound1 = 1.0 / math.sqrt(input_dim)
    bound2 = 1.0 / math.sqrt(hidden_dim)
    w1 = jax.random.uniform(k1, (input_dim, hidden_dim), dtype, -bound1, bound1)
    b1 = jax.random.uniform(k2, (hidden_dim,), dtype, -bound1, bound1)
    w2 = jax.random.uniform(k3, (hidden_dim, output_dim), dtype, -bound2, bound2)
    b2 = jax.random.uniform(k4, (output_dim,), dtype, -bound2, bound2)
    return w1, b1, w2, b2


if __name__ == "__main__":
    key = jax.random.PRNGKey(0)
    kx, kp, kx2, kp2 = jax.random.split(key, 4)

    # --- Test 1: resident-weights path, exact f32 ----------------------------
    batch, input_dim, hidden_dim, output_dim = 256, 32, 64, 16
    x = jax.random.normal(kx, (batch, input_dim), dtype=jnp.float32)
    w1, b1, w2, b2 = init_decoder_params(kp, input_dim, hidden_dim, output_dim)
    out = jax.block_until_ready(decoder_forward(x, w1, b1, w2, b2))
    ref = jnp.maximum(x @ w1 + b1, 0.0) @ w2 + b2
    assert out.shape == (batch, output_dim)
    assert jnp.allclose(out, ref, atol=1e-5, rtol=1e-5)

    # --- Test 2: bf16 compute path (native MXU dtype), f32 accumulation ------
    out_bf16 = jax.block_until_ready(
        decoder_forward(x, w1, b1, w2, b2, compute_dtype=jnp.bfloat16))
    assert out_bf16.shape == (batch, output_dim)
    assert jnp.allclose(out_bf16, ref, atol=1e-1, rtol=1e-1)

    # --- Test 3: hidden-tiled streaming-weight path (forced, small shapes) ---
    batch2, input_dim2, hidden_dim2, output_dim2 = 64, 32, 256, 24
    x2 = jax.random.normal(kx2, (batch2, input_dim2), dtype=jnp.float32)
    w1b, b1b, w2b, b2b = init_decoder_params(kp2, input_dim2, hidden_dim2,
                                             output_dim2)
    out2 = jax.block_until_ready(
        decoder_forward(x2, w1b, b1b, w2b, b2b, block_hidden=128))
    ref2 = jnp.maximum(x2 @ w1b + b1b, 0.0) @ w2b + b2b
    assert out2.shape == (batch2, output_dim2)
    assert jnp.allclose(out2, ref2, atol=1e-5, rtol=1e-5)

    print("KERNEL_OK")
</pallas_src>

<mosaic_0001>
module attributes {stable_mosaic.version = 11 : i64} {
  func.func @_decoder_kernel(%arg0: i32, %arg1: memref<256x32xf32, #tpu.memory_space<vmem>>, %arg2: memref<32x128xf32, #tpu.memory_space<vmem>>, %arg3: memref<1x128xf32, #tpu.memory_space<vmem>>, %arg4: memref<128x128xf32, #tpu.memory_space<vmem>>, %arg5: memref<1x128xf32, #tpu.memory_space<vmem>>, %arg6: memref<256x128xf32, #tpu.memory_space<vmem>>) attributes {dimension_semantics = [#tpu.dimension_semantics<parallel>], iteration_bounds = array<i64: 1>, scalar_prefetch = 0 : i64, scratch_operands = 0 : i64, tpu.core_type = #tpu.core_type<tc>, window_params = [{transform_indices = @transform_0, window_bounds = array<i64: 256, 32>}, {pipeline_mode = #tpu.pipeline_mode<synchronous>, transform_indices = @transform_1, window_bounds = array<i64: 32, 128>}, {pipeline_mode = #tpu.pipeline_mode<synchronous>, transform_indices = @transform_2, window_bounds = array<i64: 1, 128>}, {pipeline_mode = #tpu.pipeline_mode<synchronous>, transform_indices = @transform_3, window_bounds = array<i64: 128, 128>}, {pipeline_mode = #tpu.pipeline_mode<synchronous>, transform_indices = @transform_4, window_bounds = array<i64: 1, 128>}, {transform_indices = @transform_5, window_bounds = array<i64: 256, 128>}]} {
    %c0 = arith.constant 0 : index
    %c0_0 = arith.constant 0 : index
    %0 = vector.load %arg1[%c0, %c0_0] : memref<256x32xf32, #tpu.memory_space<vmem>>, vector<256x32xf32>
    %c0_1 = arith.constant 0 : index
    %c0_2 = arith.constant 0 : index
    %1 = vector.load %arg2[%c0_1, %c0_2] : memref<32x128xf32, #tpu.memory_space<vmem>>, vector<32x128xf32>
    %cst = arith.constant dense<0.000000e+00> : vector<256x128xf32>
    %2 = tpu.matmul %0, %1, %cst {dimension_numbers = #tpu.dot_dimension_numbers<[1], [0], [0], [1], [0, 0, 1, 1], [], []>} : vector<256x32xf32>, vector<32x128xf32>, vector<256x128xf32> -> vector<256x128xf32>
    %c0_3 = arith.constant 0 : index
    %c0_4 = arith.constant 0 : index
    %3 = vector.load %arg3[%c0_3, %c0_4] : memref<1x128xf32, #tpu.memory_space<vmem>>, vector<1x128xf32>
    %4 = vector.broadcast %3 : vector<1x128xf32> to vector<256x128xf32>
    %5 = arith.addf %2, %4 : vector<256x128xf32>
    %cst_5 = arith.constant 0.000000e+00 : f32
    %6 = vector.broadcast %cst_5 : f32 to vector<256x128xf32>
    %7 = arith.maximumf %5, %6 : vector<256x128xf32>
    %c0_6 = arith.constant 0 : index
    %c0_7 = arith.constant 0 : index
    %8 = vector.load %arg4[%c0_6, %c0_7] : memref<128x128xf32, #tpu.memory_space<vmem>>, vector<128x128xf32>
    %cst_8 = arith.constant dense<0.000000e+00> : vector<256x128xf32>
    %9 = tpu.matmul %7, %8, %cst_8 {dimension_numbers = #tpu.dot_dimension_numbers<[1], [0], [0], [1], [0, 0, 1, 1], [], []>} : vector<256x128xf32>, vector<128x128xf32>, vector<256x128xf32> -> vector<256x128xf32>
    %c0_9 = arith.constant 0 : index
    %c0_10 = arith.constant 0 : index
    %10 = vector.load %arg5[%c0_9, %c0_10] : memref<1x128xf32, #tpu.memory_space<vmem>>, vector<1x128xf32>
    %11 = vector.broadcast %10 : vector<1x128xf32> to vector<256x128xf32>
    %12 = arith.addf %9, %11 : vector<256x128xf32>
    %c0_11 = arith.constant 0 : index
    %c0_12 = arith.constant 0 : index
    %13 = vector.load %arg6[%c0_11, %c0_12] : memref<256x128xf32, #tpu.memory_space<vmem>>, vector<256x128xf32>
    tpu.vector_store %arg6[%c0_11, %c0_12], %12 {strides = array<i32>} : memref<256x128xf32, #tpu.memory_space<vmem>>, vector<256x128xf32>,
    return
  }
  func.func @transform_0(%arg0: i32) -> (i32, i32) {
    %c0_i32 = arith.constant 0 : i32
    %c0_i32_0 = arith.constant 0 : i32
    return %arg0, %c0_i32 : i32, i32
  }
  func.func @transform_1(%arg0: i32) -> (i32, i32) {
    %c0_i32 = arith.constant 0 : i32
    %c0_i32_0 = arith.constant 0 : i32
    %c0_i32_1 = arith.constant 0 : i32
    return %c0_i32, %c0_i32_0 : i32, i32
  }
  func.func @transform_2(%arg0: i32) -> (i32, i32) {
    %c0_i32 = arith.constant 0 : i32
    %c0_i32_0 = arith.constant 0 : i32
    %c0_i32_1 = arith.constant 0 : i32
    return %c0_i32, %c0_i32_0 : i32, i32
  }
  func.func @transform_3(%arg0: i32) -> (i32, i32) {
    %c0_i32 = arith.constant 0 : i32
    %c0_i32_0 = arith.constant 0 : i32
    %c0_i32_1 = arith.constant 0 : i32
    return %c0_i32, %c0_i32_0 : i32, i32
  }
  func.func @transform_4(%arg0: i32) -> (i32, i32) {
    %c0_i32 = arith.constant 0 : i32
    %c0_i32_0 = arith.constant 0 : i32
    %c0_i32_1 = arith.constant 0 : i32
    return %c0_i32, %c0_i32_0 : i32, i32
  }
  func.func @transform_5(%arg0: i32) -> (i32, i32) {
    %c0_i32 = arith.constant 0 : i32
    %c0_i32_0 = arith.constant 0 : i32
    return %arg0, %c0_i32 : i32, i32
  }
}

</mosaic_0001>

<bundles_post_ra>
// kernel: tpu_custom_call.1
= control target key start
LH: loop header
LB: loop body
LE: loop exit
PB: predicated region body
PF: predicated region fallthrough
CT: control target
= control target key end

     0   :  { %vm64_vm0 = vcmask 261120   ;;  %s1358_s0 = inlined_call_operand.vmem [shape: f32[256,32], index: 0, kind: input, shape index: {}]   ;;  %s1359_s1 = inlined_call_operand.vmem [shape: f32[32,128], index: 1, kind: input, shape index: {}]   ;;  %s1360_s2 = inlined_call_operand.vmem [shape: f32[1,128], index: 2, kind: input, shape index: {}]   ;;  %s1361_s3 = inlined_call_operand.vmem [shape: f32[128,128], index: 3, kind: input, shape index: {}]   ;;  %s1362_s4 = inlined_call_operand.vmem [shape: f32[1,128], index: 4, kind: input, shape index: {}]   ;;  %s1363_s5 = inlined_call_operand.hbm [shape: f32[256,128], index: 5, kind: output, shape index: {}]  }
   0x1   :  { %v53_v0 = vld [vmem:[%s1359_s1] sm:$0xff]  ;;  %v54_v1 = vld [vmem:[%s1359_s1 + $0x8] sm:$0xff]  ;;  %v55_v2 = vld [vmem:[%s1359_s1 + $0x10] sm:$0xff] }
   0x2   :  { %v968_v3 = vpack.c.bf16 %v54_v1, %v53_v0  ;;  %v56_v4 = vld [vmem:[%s1359_s1 + $0x18] sm:$0xff]  ;;  %v21_v5 = vld [vmem:[%s1358_s0] sm:$0xff]  ;;  %v22_v7 = vld [vmem:[%s1358_s0 + $0x8] sm:$0xff] }
   0x3   :  { %v972_v6 = vpack.c.bf16 %v56_v4, %v55_v2  ;;  %840 = vmatprep.mubr.msk.f32.mxu0 %vm64_vm0, %v21_v5  ;;  %v23_v8 = vld [vmem:[%s1358_s0 + $0x10] sm:$0xff]  ;;  %v24_v9 = vld [vmem:[%s1358_s0 + $0x18] sm:$0xff]  ;;  %v418_v10 = vld [vmem:[%s1361_s3] sm:$0xff] }
   0x4   :  { %969 = vmatprep.subr.bf16.mxu0 %v968_v3  ;;  %v419_v11 = vld [vmem:[%s1361_s3 + $0x8] sm:$0xff]  ;;  %v420_v12 = vld [vmem:[%s1361_s3 + $0x10] sm:$0xff]  ;;  %v25_v13 = vld [vmem:[%s1358_s0 + $0x20] sm:$0xff] }
   0x5   :  { %971 = vmatpush3.bf16.msra.mxu0 %v968_v3  ;;  %v976_v14 = vpack.c.bf16 %v419_v11, %v418_v10  ;;  %v421_v15 = vld [vmem:[%s1361_s3 + $0x18] sm:$0xff]  ;;  %v422_v17 = vld [vmem:[%s1361_s3 + $0x20] sm:$0xff]  ;;  %v423_v18 = vld [vmem:[%s1361_s3 + $0x28] sm:$0xff] }
   0x6   :  { %973 = vmatprep.subr.bf16.mxu0 %v972_v6  ;;  %v980_v16 = vpack.c.bf16 %v421_v15, %v420_v12  ;;  %v26_v19 = vld [vmem:[%s1358_s0 + $0x28] sm:$0xff] }
   0x9   :  { %975 = vmatpush3.bf16.msra.mxu0 %v972_v6 }
   0xa   :  { %977 = vmatprep.subr.bf16.mxu0 %v976_v14 }
   0xc   :  { %841 = vmatmul.mubr.msk.f32.vlgmr.msra.gmra.mrb[0].mxu0 %vm64_vm0, %v22_v7 }
   0xd   :  { %843 = vmatprep.mubr.msk.f32.mxu0 %vm64_vm0, %v23_v8  ;;  %979 = vmatpush3.bf16.msra.mxu0 %v976_v14 }
  0x10   :  { %844 = vmatmul.mubr.msk.f32.gmra.mrb[2].mxu0 %vm64_vm0, %v24_v9 }
  0x11   :  { %846 = vmatprep.mubr.msk.f32.mxu0 %vm64_vm0, %v25_v13 }
  0x12   :  { %10 = vsyncpa [#allocation3], 0  ;;  %v27_v20 = vld [vmem:[%s1358_s0 + $0x30] sm:$0xff]  ;;  %981 = vmatprep.subr.bf16.mxu0 %v980_v16  ;;  %v984_v21 = vpack.c.bf16 %v423_v18, %v422_v17  ;;  %1008 = vmatprep.subr.bf16.mxu1 %v976_v14  ;;  %v425_v23 = vld [vmem:[%s1361_s3 + $0x38] sm:$0xff] }
  0x13   :  { %v424_v22 = vld [vmem:[%s1361_s3 + $0x30] sm:$0xff]  ;;  %1016 = vmatpush3.bf16.msra.mxu1 %v976_v14  ;;  %v28_v24 = vld [vmem:[%s1358_s0 + $0x38] sm:$0xff]  ;;  %983 = vmatpush3.bf16.msra.mxu0 %v980_v16  ;;  %v29_v25 = vld [vmem:[%s1358_s0 + $0x40] sm:$0xff] }
  0x14   :  { %847 = vmatmul.mubr.msk.f32.gmra.mrb[4].mxu0 %vm64_vm0, %v26_v19  ;;  %1009 = vmatprep.subr.bf16.mxu1 %v980_v16  ;;  %v988_v26 = vpack.c.bf16 %v425_v23, %v424_v22  ;;  %v426_v27 = vld [vmem:[%s1361_s3 + $0x40] sm:$0xff]  ;;  %v427_v28 = vld [vmem:[%s1361_s3 + $0x48] sm:$0xff]  ;;  %v31_v30 = vld [vmem:[%s1358_s0 + $0x50] sm:$0xff] }
  0x15   :  { %849 = vmatprep.mubr.msk.f32.mxu0 %vm64_vm0, %v27_v20  ;;  %985 = vmatprep.subr.bf16.mxu0 %v984_v21  ;;  %v30_v29 = vld [vmem:[%s1358_s0 + $0x48] sm:$0xff]  ;;  %v992_v31 = vpack.c.bf16 %v427_v28, %v426_v27  ;;  %v428_v32 = vld [vmem:[%s1361_s3 + $0x50] sm:$0xff]  ;;  %v429_v33 = vld [vmem:[%s1361_s3 + $0x58] sm:$0xff] }
  0x16   :  { %v32_v34 = vld [vmem:[%s1358_s0 + $0x58] sm:$0xff]  ;;  %v33_v35 = vld [vmem:[%s1358_s0 + $0x60] sm:$0xff]  ;;  %v996_v36 = vpack.c.bf16 %v429_v33, %v428_v32  ;;  %v431_v38 = vld [vmem:[%s1361_s3 + $0x68] sm:$0xff] }
  0x17   :  { %1017 = vmatpush3.bf16.msra.mxu1 %v980_v16  ;;  %987 = vmatpush3.bf16.msra.mxu0 %v984_v21  ;;  %v430_v37 = vld [vmem:[%s1361_s3 + $0x60] sm:$0xff]  ;;  %v34_v39 = vld [vmem:[%s1358_s0 + $0x68] sm:$0xff]  ;;  %v35_v40 = vld [vmem:[%s1358_s0 + $0x70] sm:$0xff] }
  0x18   :  { %850 = vmatmul.mubr.msk.f32.gmra.mrb[6].mxu0 %vm64_vm0, %v28_v24  ;;  %1010 = vmatprep.subr.bf16.mxu1 %v984_v21  ;;  %v1000_v41 = vpack.c.bf16 %v431_v38, %v430_v37  ;;  %v36_v42 = vld [vmem:[%s1358_s0 + $0x78] sm:$0xff]  ;;  %v37_v43 = vld [vmem:[%s1358_s0 + $0x80] sm:$0xff]  ;;  %v38_v44 = vld [vmem:[%s1358_s0 + $0x88] sm:$0xff] }
  0x19   :  { %852 = vmatprep.mubr.msk.f32.mxu0 %vm64_vm0, %v29_v25  ;;  %989 = vmatprep.subr.bf16.mxu0 %v988_v26  ;;  %v39_v45 = vld [vmem:[%s1358_s0 + $0x90] sm:$0xff]  ;;  %v40_v46 = vld [vmem:[%s1358_s0 + $0x98] sm:$0xff]  ;;  %v41_v47 = vld [vmem:[%s1358_s0 + $0xa0] sm:$0xff] }
  0x1a   :  { %v42_v48 = vld [vmem:[%s1358_s0 + $0xa8] sm:$0xff]  ;;  %v43_v49 = vld [vmem:[%s1358_s0 + $0xb0] sm:$0xff]  ;;  %v44_v50 = vld [vmem:[%s1358_s0 + $0xb8] sm:$0xff] }
  0x1b   :  { %1018 = vmatpush3.bf16.msra.mxu1 %v984_v21  ;;  %991 = vmatpush3.bf16.msra.mxu0 %v988_v26  ;;  %v45_v51 = vld [vmem:[%s1358_s0 + $0xc0] sm:$0xff]  ;;  %v46_v52 = vld [vmem:[%s1358_s0 + $0xc8] sm:$0xff]  ;;  %v47_v53 = vld [vmem:[%s1358_s0 + $0xd0] sm:$0xff] }
  0x1c   :  { %853 = vmatmul.mubr.msk.f32.gmra.mrb[8].mxu0 %vm64_vm0, %v30_v29  ;;  %1011 = vmatprep.subr.bf16.mxu1 %v988_v26  ;;  %v48_v54 = vld [vmem:[%s1358_s0 + $0xd8] sm:$0xff]  ;;  %v49_v55 = vld [vmem:[%s1358_s0 + $0xe0] sm:$0xff]  ;;  %v50_v56 = vld [vmem:[%s1358_s0 + $0xe8] sm:$0xff] }
  0x1d   :  { %855 = vmatprep.mubr.msk.f32.mxu0 %vm64_vm0, %v31_v30  ;;  %993 = vmatprep.subr.bf16.mxu0 %v992_v31  ;;  %v51_v57 = vld [vmem:[%s1358_s0 + $0xf0] sm:$0xff]  ;;  %v52_v58 = vld [vmem:[%s1358_s0 + $0xf8] sm:$0xff]  ;;  %v1275_v62 = vld [vmem:[%s1360_s2] ss:$0 sm:$0xff] }
  0x1e   :  { %v432_v59 = vld [vmem:[%s1361_s3 + $0x70] sm:$0xff]  ;;  %v433_v60 = vld [vmem:[%s1361_s3 + $0x78] sm:$0xff]  ;;  %s1051_s3 = smov [#allocation2]  }
  0x1f   :  { %1019 = vmatpush3.bf16.msra.mxu1 %v988_v26  ;;  %995 = vmatpush3.bf16.msra.mxu0 %v992_v31  ;;  %v1004_v61 = vpack.c.bf16 %v433_v60, %v432_v59 }
  0x20   :  { %856 = vmatmul.mubr.msk.f32.gmra.mrb[10].mxu0 %vm64_vm0, %v32_v34  ;;  %1012 = vmatprep.subr.bf16.mxu1 %v992_v31 }
  0x21   :  { %858 = vmatprep.mubr.msk.f32.mxu0 %vm64_vm0, %v33_v35  ;;  %997 = vmatprep.subr.bf16.mxu0 %v996_v36 }
  0x23   :  { %1020 = vmatpush3.bf16.msra.mxu1 %v992_v31  ;;  %999 = vmatpush3.bf16.msra.mxu0 %v996_v36 }
  0x24   :  { %859 = vmatmul.mubr.msk.f32.gmra.mrb[12].mxu0 %vm64_vm0, %v34_v39  ;;  %1013 = vmatprep.subr.bf16.mxu1 %v996_v36 }
  0x25   :  { %861 = vmatprep.mubr.msk.f32.mxu0 %vm64_vm0, %v35_v40  ;;  %1001 = vmatprep.subr.bf16.mxu0 %v1000_v41 }
  0x27   :  { %1021 = vmatpush3.bf16.msra.mxu1 %v996_v36  ;;  %1003 = vmatpush3.bf16.msra.mxu0 %v1000_v41 }
  0x28   :  { %862 = vmatmul.mubr.msk.f32.gmra.mrb[14].mxu0 %vm64_vm0, %v36_v42  ;;  %1014 = vmatprep.subr.bf16.mxu1 %v1000_v41 }
  0x29   :  { %864 = vmatprep.mubr.msk.f32.mxu0 %vm64_vm0, %v37_v43  ;;  %1005 = vmatprep.subr.bf16.mxu0 %v1004_v61 }
  0x2b   :  { %1022 = vmatpush3.bf16.msra.mxu1 %v1000_v41  ;;  %1007 = vmatpush3.bf16.msra.mxu0 %v1004_v61 }
  0x2c   :  { %865 = vmatmul.mubr.msk.f32.gmra.mrb[16].mxu0 %vm64_vm0, %v38_v44  ;;  %1015 = vmatprep.subr.bf16.mxu1 %v1004_v61 }
  0x2d   :  { %867 = vmatprep.mubr.msk.f32.mxu0 %vm64_vm0, %v39_v45 }
  0x2f   :  { %1023 = vmatpush3.bf16.msra.mxu1 %v1004_v61 }
  0x30   :  { %868 = vmatmul.mubr.msk.f32.gmra.mrb[18].mxu0 %vm64_vm0, %v40_v46 }
  0x31   :  { %870 = vmatprep.mubr.msk.f32.mxu0 %vm64_vm0, %v41_v47 }
  0x34   :  { %871 = vmatmul.mubr.msk.f32.gmra.mrb[20].mxu0 %vm64_vm0, %v42_v48 }
  0x35   :  { %873 = vmatprep.mubr.msk.f32.mxu0 %vm64_vm0, %v43_v49 }
  0x38   :  { %874 = vmatmul.mubr.msk.f32.gmra.mrb[22].mxu0 %vm64_vm0, %v44_v50 }
  0x39   :  { %876 = vmatprep.mubr.msk.f32.mxu0 %vm64_vm0, %v45_v51 }
  0x3c   :  { %877 = vmatmul.mubr.msk.f32.gmra.mrb[24].mxu0 %vm64_vm0, %v46_v52 }
  0x3d   :  { %879 = vmatprep.mubr.msk.f32.mxu0 %vm64_vm0, %v47_v53 }
  0x40   :  { %880 = vmatmul.mubr.msk.f32.gmra.mrb[26].mxu0 %vm64_vm0, %v48_v54 }
  0x41   :  { %882 = vmatprep.mubr.msk.f32.mxu0 %vm64_vm0, %v49_v55 }
  0x44   :  { %883 = vmatmul.mubr.msk.f32.gmra.mrb[28].mxu0 %vm64_vm0, %v50_v56 }
  0x45   :  { %885 = vmatprep.mubr.msk.f32.mxu0 %vm64_vm0, %v51_v57 }
  0x48   :  { %886 = vmatmul.mubr.msk.f32.gmra.mrb[30].mxu0 %vm64_vm0, %v52_v58 }
  0xdf   :  { %v842_v63 = vpop.f32.mrb[0].mxu0 }
  0xe0   :  { %v233_v0 = vadd.f32 %v842_v63, %v1275_v62  ;;  %v227_v1 = vpop.f32.mrb[1].mxu0 }
  0xe1   :  { %v228_v2 = vadd.f32 %v1275_v62, %v227_v1 }
  0xe2   :  { %v387_v5 = vmax.f32 %v233_v0, 0.0 }
  0xe3   :  { %v386_v3 = vmax.f32 %v228_v2, 0.0  ;;  %v845_v4 = vpop.f32.mrb[2].mxu0 }
  0xe4   :  { %v243_v6 = vadd.f32 %v845_v4, %v1275_v62  ;;  %v237_v7 = vpop.f32.mrb[3].mxu0 }
  0xe5   :  { %v238_v8 = vadd.f32 %v1275_v62, %v237_v7  ;;  %920 = vmatprep.mubr.f32.mxu0 %v386_v3 }
  0xe6   :  { %921 = vmatmul.mubr.f32.vlgmr.msra.gmra.mrb[32].mxu0 %v387_v5  ;;  %v389_v11 = vmax.f32 %v243_v6, 0.0 }
  0xe7   :  { %v388_v9 = vmax.f32 %v238_v8, 0.0  ;;  %v848_v10 = vpop.f32.mrb[4].mxu0 }
  0xe8   :  { %v253_v12 = vadd.f32 %v848_v10, %v1275_v62  ;;  %v247_v13 = vpop.f32.mrb[5].mxu0 }
  0xe9   :  { %v248_v14 = vadd.f32 %v1275_v62, %v247_v13  ;;  %923 = vmatprep.mubr.f32.mxu0 %v388_v9 }
  0xea   :  { %924 = vmatmul.mubr.f32.gmra.mrb[34].mxu0 %v389_v11  ;;  %v391_v17 = vmax.f32 %v253_v12, 0.0 }
  0xeb   :  { %v390_v15 = vmax.f32 %v248_v14, 0.0  ;;  %v851_v16 = vpop.f32.mrb[6].mxu0 }
  0xec   :  { %v263_v18 = vadd.f32 %v851_v16, %v1275_v62  ;;  %v257_v19 = vpop.f32.mrb[7].mxu0 }
  0xed   :  { %926 = vmatprep.mubr.f32.mxu0 %v390_v15  ;;  %v258_v20 = vadd.f32 %v1275_v62, %v257_v19 }
  0xee   :  { %927 = vmatmul.mubr.f32.gmra.mrb[36].mxu0 %v391_v17  ;;  %v393_v23 = vmax.f32 %v263_v18, 0.0 }
  0xef   :  { %v854_v21 = vpop.f32.mrb[8].mxu0  ;;  %v392_v22 = vmax.f32 %v258_v20, 0.0 }
  0xf0   :  { %v273_v24 = vadd.f32 %v854_v21, %v1275_v62  ;;  %v267_v25 = vpop.f32.mrb[9].mxu0 }
  0xf1   :  { %v268_v26 = vadd.f32 %v1275_v62, %v267_v25  ;;  %929 = vmatprep.mubr.f32.mxu1 %v392_v22 }
  0xf2   :  { %930 = vmatmul.mubr.f32.vlgmr.msra.gmra.mrb[0].mxu1 %v393_v23  ;;  %v395_v29 = vmax.f32 %v273_v24, 0.0 }
  0xf3   :  { %v394_v27 = vmax.f32 %v268_v26, 0.0  ;;  %v857_v28 = vpop.f32.mrb[10].mxu0 }
  0xf4   :  { %v283_v30 = vadd.f32 %v857_v28, %v1275_v62  ;;  %v277_v31 = vpop.f32.mrb[11].mxu0 }
  0xf5   :  { %v278_v32 = vadd.f32 %v1275_v62, %v277_v31  ;;  %932 = vmatprep.mubr.f32.mxu1 %v394_v27 }
  0xf6   :  { %933 = vmatmul.mubr.f32.gmra.mrb[2].mxu1 %v395_v29  ;;  %v397_v35 = vmax.f32 %v283_v30, 0.0 }
  0xf7   :  { %v396_v33 = vmax.f32 %v278_v32, 0.0  ;;  %v860_v34 = vpop.f32.mrb[12].mxu0  ;;  %v1312_v32 = vld [vmem:[%s1362_s4] ss:$0 sm:$0xff]  ;;  %s703_s4 = sshll.u32 %s1051_s3, 4  ;;  %s704_s4 = int_to_ptr.vmem [resolvable:$true] %s703_s4 }
  0xf8   :  { %v293_v36 = vadd.f32 %v860_v34, %v1275_v62  ;;  %v287_v37 = vpop.f32.mrb[13].mxu0  ;;  %s1027_s20 = scalar_lea.vmem %s704_s4, 4096  ;;  %p1032_p1 = scmp.lt.s32.totalorder %s704_s4, %s704_s4 }
  0xf9   :  { %v288_v38 = vadd.f32 %v1275_v62, %v287_v37  ;;  %935 = vmatprep.mubr.f32.mxu1 %v396_v33  ;;  %p1028_p0 = scmp.ne.s32.totalorder %s704_s4, %s1027_s20  ;;  %p1033_p2 = scmp.lt.s32.totalorder %s1027_s20, %s1027_s20 }
  0xfa   :  { %936 = vmatmul.mubr.f32.gmra.mrb[4].mxu1 %v397_v35  ;;  %v399_v41 = vmax.f32 %v293_v36, 0.0 }
  0xfb   :  { %v398_v39 = vmax.f32 %v288_v38, 0.0  ;;  %v863_v40 = vpop.f32.mrb[14].mxu0  ;;  %p1034_p3 = por %p1033_p2, %p1032_p1 }
  0xfc   :  { %v303_v42 = vadd.f32 %v863_v40, %v1275_v62  ;;  %v297_v43 = vpop.f32.mrb[15].mxu0 }
  0xfd   :  { %v298_v44 = vadd.f32 %v1275_v62, %v297_v43  ;;  %938 = vmatprep.mubr.f32.mxu1 %v398_v39  ;;  %p1035_p4 = pnand %p1034_p3, %p1028_p0 }
  0xfe   :  { %939 = vmatmul.mubr.f32.gmra.mrb[6].mxu1 %v399_v41  ;;  %v401_v47 = vmax.f32 %v303_v42, 0.0 }
  0xff   :  { %v400_v45 = vmax.f32 %v298_v44, 0.0  ;;  %v866_v46 = vpop.f32.mrb[16].mxu0 }
 0x100   :  { %v313_v48 = vadd.f32 %v866_v46, %v1275_v62  ;;  %v307_v49 = vpop.f32.mrb[17].mxu0 }
 0x101   :  { %v308_v50 = vadd.f32 %v1275_v62, %v307_v49  ;;  %941 = vmatprep.mubr.f32.mxu1 %v400_v45 }
 0x102   :  { %942 = vmatmul.mubr.f32.gmra.mrb[8].mxu1 %v401_v47  ;;  %v403_v53 = vmax.f32 %v313_v48, 0.0 }
 0x103   :  { %v402_v51 = vmax.f32 %v308_v50, 0.0  ;;  %v869_v52 = vpop.f32.mrb[18].mxu0 }
 0x104   :  { %v323_v54 = vadd.f32 %v869_v52, %v1275_v62  ;;  %v317_v55 = vpop.f32.mrb[19].mxu0 }
 0x105   :  { %v318_v56 = vadd.f32 %v1275_v62, %v317_v55  ;;  %944 = vmatprep.mubr.f32.mxu1 %v402_v51 }
 0x106   :  { %945 = vmatmul.mubr.f32.gmra.mrb[10].mxu1 %v403_v53  ;;  %v405_v59 = vmax.f32 %v323_v54, 0.0 }
 0x107   :  { %v404_v57 = vmax.f32 %v318_v56, 0.0  ;;  %v872_v58 = vpop.f32.mrb[20].mxu0 }
 0x108   :  { %v333_v60 = vadd.f32 %v872_v58, %v1275_v62  ;;  %v327_v61 = vpop.f32.mrb[21].mxu0 }
 0x109   :  { %v328_v63 = vadd.f32 %v1275_v62, %v327_v61  ;;  %947 = vmatprep.mubr.f32.mxu1 %v404_v57 }
 0x10a   :  { %948 = vmatmul.mubr.f32.gmra.mrb[12].mxu1 %v405_v59  ;;  %v407_v2 = vmax.f32 %v333_v60, 0.0 }
 0x10b   :  { %v406_v0 = vmax.f32 %v328_v63, 0.0  ;;  %v875_v1 = vpop.f32.mrb[22].mxu0 }
 0x10c   :  { %v343_v3 = vadd.f32 %v875_v1, %v1275_v62  ;;  %v337_v4 = vpop.f32.mrb[23].mxu0 }
 0x10d   :  { %v338_v5 = vadd.f32 %v1275_v62, %v337_v4  ;;  %950 = vmatprep.mubr.f32.mxu1 %v406_v0 }
 0x10e   :  { %951 = vmatmul.mubr.f32.gmra.mrb[14].mxu1 %v407_v2  ;;  %v409_v8 = vmax.f32 %v343_v3, 0.0 }
 0x10f   :  { %v408_v6 = vmax.f32 %v338_v5, 0.0  ;;  %v878_v7 = vpop.f32.mrb[24].mxu0 }
 0x110   :  { %v353_v9 = vadd.f32 %v878_v7, %v1275_v62  ;;  %v347_v10 = vpop.f32.mrb[25].mxu0 }
 0x111   :  { %v348_v11 = vadd.f32 %v1275_v62, %v347_v10  ;;  %953 = vmatprep.mubr.f32.mxu1 %v408_v6 }
 0x112   :  { %954 = vmatmul.mubr.f32.gmra.mrb[16].mxu1 %v409_v8  ;;  %v411_v14 = vmax.f32 %v353_v9, 0.0 }
 0x113   :  { %v410_v12 = vmax.f32 %v348_v11, 0.0  ;;  %v881_v13 = vpop.f32.mrb[26].mxu0 }
 0x114   :  { %v363_v15 = vadd.f32 %v881_v13, %v1275_v62  ;;  %v357_v16 = vpop.f32.mrb[27].mxu0 }
 0x115   :  { %v358_v17 = vadd.f32 %v1275_v62, %v357_v16  ;;  %956 = vmatprep.mubr.f32.mxu1 %v410_v12 }
 0x116   :  { %957 = vmatmul.mubr.f32.gmra.mrb[18].mxu1 %v411_v14  ;;  %v413_v20 = vmax.f32 %v363_v15, 0.0 }
 0x117   :  { %v412_v18 = vmax.f32 %v358_v17, 0.0  ;;  %v884_v19 = vpop.f32.mrb[28].mxu0 }
 0x118   :  { %v373_v21 = vadd.f32 %v884_v19, %v1275_v62  ;;  %v367_v22 = vpop.f32.mrb[29].mxu0 }
 0x119   :  { %v368_v23 = vadd.f32 %v1275_v62, %v367_v22  ;;  %959 = vmatprep.mubr.f32.mxu1 %v412_v18 }
 0x11a   :  { %960 = vmatmul.mubr.f32.gmra.mrb[20].mxu1 %v413_v20  ;;  %v415_v26 = vmax.f32 %v373_v21, 0.0 }
 0x11b   :  { %v414_v24 = vmax.f32 %v368_v23, 0.0  ;;  %v887_v25 = vpop.f32.mrb[30].mxu0 }
 0x11c   :  { %v383_v27 = vadd.f32 %v887_v25, %v1275_v62  ;;  %v377_v28 = vpop.f32.mrb[31].mxu0 }
 0x11d   :  { %v378_v29 = vadd.f32 %v1275_v62, %v377_v28  ;;  %962 = vmatprep.mubr.f32.mxu1 %v414_v24 }
 0x11e   :  { %963 = vmatmul.mubr.f32.gmra.mrb[22].mxu1 %v415_v26  ;;  %v417_v31 = vmax.f32 %v383_v27, 0.0 }
 0x11f   :  { %v416_v30 = vmax.f32 %v378_v29, 0.0 }
 0x121   :  { %965 = vmatprep.mubr.f32.mxu1 %v416_v30 }
 0x122   :  { %966 = vmatmul.mubr.f32.gmra.mrb[24].mxu1 %v417_v31 }
 0x1b9   :  { %v922_v33 = vpop.f32.mrb[32].mxu0 }
 0x1ba   :  { %v513_v34 = vadd.f32 %v922_v33, %v1312_v32  ;;  %v507_v35 = vpop.f32.mrb[33].mxu0 }
 0x1bb   :  { %v508_v36 = vadd.f32 %v1312_v32, %v507_v35 }
 0x1bc   :  { %667 = vst [vmem:[#allocation2 + $0x8] sm:$0xff] %v513_v34 }
 0x1bd   :  { %666 = vst [vmem:[#allocation2] sm:$0xff] %v508_v36  ;;  %v925_v62 = vpop.f32.mrb[34].mxu0 }
 0x1be   :  { %v523_v37 = vadd.f32 %v925_v62, %v1312_v32  ;;  %v517_v38 = vpop.f32.mrb[35].mxu0 }
 0x1bf   :  { %v518_v39 = vadd.f32 %v1312_v32, %v517_v38 }
 0x1c0   :  { %669 = vst [vmem:[#allocation2 + $0x18] sm:$0xff] %v523_v37 }
 0x1c1   :  { %668 = vst [vmem:[#allocation2 + $0x10] sm:$0xff] %v518_v39  ;;  %v928_v40 = vpop.f32.mrb[36].mxu0 }
 0x1c2   :  { %v533_v41 = vadd.f32 %v928_v40, %v1312_v32  ;;  %v527_v42 = vpop.f32.mrb[37].mxu0 }
 0x1c3   :  { %v528_v43 = vadd.f32 %v1312_v32, %v527_v42 }
 0x1c4   :  { %671 = vst [vmem:[#allocation2 + $0x28] sm:$0xff] %v533_v41 }
 0x1c5   :  { %670 = vst [vmem:[#allocation2 + $0x20] sm:$0xff] %v528_v43  ;;  %v931_v44 = vpop.f32.mrb[0].mxu1 }
 0x1c6   :  { %v543_v45 = vadd.f32 %v931_v44, %v1312_v32  ;;  %v537_v46 = vpop.f32.mrb[1].mxu1 }
 0x1c7   :  { %v538_v47 = vadd.f32 %v1312_v32, %v537_v46 }
 0x1c8   :  { %673 = vst [vmem:[#allocation2 + $0x38] sm:$0xff] %v543_v45 }
 0x1c9   :  { %672 = vst [vmem:[#allocation2 + $0x30] sm:$0xff] %v538_v47  ;;  %v934_v48 = vpop.f32.mrb[2].mxu1 }
 0x1ca   :  { %v553_v49 = vadd.f32 %v934_v48, %v1312_v32  ;;  %v547_v50 = vpop.f32.mrb[3].mxu1 }
 0x1cb   :  { %v548_v51 = vadd.f32 %v1312_v32, %v547_v50 }
 0x1cc   :  { %675 = vst [vmem:[#allocation2 + $0x48] sm:$0xff] %v553_v49 }
 0x1cd   :  { %674 = vst [vmem:[#allocation2 + $0x40] sm:$0xff] %v548_v51  ;;  %v937_v52 = vpop.f32.mrb[4].mxu1 }
 0x1ce   :  { %v563_v53 = vadd.f32 %v937_v52, %v1312_v32  ;;  %v557_v54 = vpop.f32.mrb[5].mxu1 }
 0x1cf   :  { %v558_v55 = vadd.f32 %v1312_v32, %v557_v54 }
 0x1d0   :  { %677 = vst [vmem:[#allocation2 + $0x58] sm:$0xff] %v563_v53 }
 0x1d1   :  { %676 = vst [vmem:[#allocation2 + $0x50] sm:$0xff] %v558_v55  ;;  %v940_v56 = vpop.f32.mrb[6].mxu1 }
 0x1d2   :  { %v573_v57 = vadd.f32 %v940_v56, %v1312_v32  ;;  %v567_v58 = vpop.f32.mrb[7].mxu1 }
 0x1d3   :  { %v568_v59 = vadd.f32 %v1312_v32, %v567_v58 }
 0x1d4   :  { %679 = vst [vmem:[#allocation2 + $0x68] sm:$0xff] %v573_v57 }
 0x1d5   :  { %678 = vst [vmem:[#allocation2 + $0x60] sm:$0xff] %v568_v59  ;;  %v943_v60 = vpop.f32.mrb[8].mxu1 }
 0x1d6   :  { %v583_v61 = vadd.f32 %v943_v60, %v1312_v32  ;;  %v577_v63 = vpop.f32.mrb[9].mxu1 }
 0x1d7   :  { %v578_v0 = vadd.f32 %v1312_v32, %v577_v63 }
 0x1d8   :  { %681 = vst [vmem:[#allocation2 + $0x78] sm:$0xff] %v583_v61 }
 0x1d9   :  { %680 = vst [vmem:[#allocation2 + $0x70] sm:$0xff] %v578_v0  ;;  %v946_v1 = vpop.f32.mrb[10].mxu1 }
 0x1da   :  { %v593_v2 = vadd.f32 %v946_v1, %v1312_v32  ;;  %v587_v3 = vpop.f32.mrb[11].mxu1 }
 0x1db   :  { %v588_v4 = vadd.f32 %v1312_v32, %v587_v3 }
 0x1dc   :  { %683 = vst [vmem:[#allocation2 + $0x88] sm:$0xff] %v593_v2 }
 0x1dd   :  { %682 = vst [vmem:[#allocation2 + $0x80] sm:$0xff] %v588_v4  ;;  %v949_v5 = vpop.f32.mrb[12].mxu1 }
 0x1de   :  { %v603_v6 = vadd.f32 %v949_v5, %v1312_v32  ;;  %v597_v7 = vpop.f32.mrb[13].mxu1 }
 0x1df   :  { %v598_v8 = vadd.f32 %v1312_v32, %v597_v7 }
 0x1e0   :  { %685 = vst [vmem:[#allocation2 + $0x98] sm:$0xff] %v603_v6 }
 0x1e1   :  { %684 = vst [vmem:[#allocation2 + $0x90] sm:$0xff] %v598_v8  ;;  %v952_v9 = vpop.f32.mrb[14].mxu1 }
 0x1e2   :  { %v613_v10 = vadd.f32 %v952_v9, %v1312_v32  ;;  %v607_v11 = vpop.f32.mrb[15].mxu1 }
 0x1e3   :  { %v608_v12 = vadd.f32 %v1312_v32, %v607_v11 }
 0x1e4   :  { %687 = vst [vmem:[#allocation2 + $0xa8] sm:$0xff] %v613_v10 }
 0x1e5   :  { %686 = vst [vmem:[#allocation2 + $0xa0] sm:$0xff] %v608_v12  ;;  %v955_v13 = vpop.f32.mrb[16].mxu1 }
 0x1e6   :  { %v623_v14 = vadd.f32 %v955_v13, %v1312_v32  ;;  %v617_v15 = vpop.f32.mrb[17].mxu1 }
 0x1e7   :  { %v618_v16 = vadd.f32 %v1312_v32, %v617_v15 }
 0x1e8   :  { %689 = vst [vmem:[#allocation2 + $0xb8] sm:$0xff] %v623_v14 }
 0x1e9   :  { %688 = vst [vmem:[#allocation2 + $0xb0] sm:$0xff] %v618_v16  ;;  %v958_v17 = vpop.f32.mrb[18].mxu1 }
 0x1ea   :  { %v633_v18 = vadd.f32 %v958_v17, %v1312_v32  ;;  %v627_v19 = vpop.f32.mrb[19].mxu1 }
 0x1eb   :  { %v628_v20 = vadd.f32 %v1312_v32, %v627_v19 }
 0x1ec   :  { %691 = vst [vmem:[#allocation2 + $0xc8] sm:$0xff] %v633_v18 }
 0x1ed   :  { %690 = vst [vmem:[#allocation2 + $0xc0] sm:$0xff] %v628_v20  ;;  %v961_v21 = vpop.f32.mrb[20].mxu1 }
 0x1ee   :  { %v643_v22 = vadd.f32 %v961_v21, %v1312_v32  ;;  %v637_v23 = vpop.f32.mrb[21].mxu1 }
 0x1ef   :  { %v638_v24 = vadd.f32 %v1312_v32, %v637_v23 }
 0x1f0   :  { %693 = vst [vmem:[#allocation2 + $0xd8] sm:$0xff] %v643_v22 }
 0x1f1   :  { %692 = vst [vmem:[#allocation2 + $0xd0] sm:$0xff] %v638_v24  ;;  %v964_v25 = vpop.f32.mrb[22].mxu1 }
 0x1f2   :  { %v653_v26 = vadd.f32 %v964_v25, %v1312_v32  ;;  %v647_v27 = vpop.f32.mrb[23].mxu1 }
 0x1f3   :  { %v648_v28 = vadd.f32 %v1312_v32, %v647_v27 }
 0x1f4   :  { %695 = vst [vmem:[#allocation2 + $0xe8] sm:$0xff] %v653_v26 }
 0x1f5   :  { %694 = vst [vmem:[#allocation2 + $0xe0] sm:$0xff] %v648_v28  ;;  %v967_v29 = vpop.f32.mrb[24].mxu1 }
 0x1f6   :  { %v663_v30 = vadd.f32 %v967_v29, %v1312_v32  ;;  %v657_v31 = vpop.f32.mrb[25].mxu1 }
 0x1f7   :  { %v658_v33 = vadd.f32 %v1312_v32, %v657_v31 }
 0x1f8   :  { %697 = vst [vmem:[#allocation2 + $0xf8] sm:$0xff] %v663_v30 }
 0x1f9   :  { %696 = vst [vmem:[#allocation2 + $0xf0] sm:$0xff] %v658_v33 }
 0x1fa   :  { %1038 = shalt.err (!%p1035_p4)
}
 0x1fb   :  { %s1039_s23 = scalar_lea.hbm %s1363_s5, 4096 }
 0x1fc   :  { %p1040_p5 = scmp.ne.s32.totalorder %s1363_s5, %s1039_s23  ;;  %p1043_p6 = scmp.lt.u32.totalorder %s1039_s23, %s1363_s5 }
 0x1fe   :  { %p1045_p7 = pnand %p1043_p6, %p1040_p5 }
 0x200   :  { %1048 = shalt.err (!%p1045_p7)
}
 0x201   :  { %s1052_s28 = smov 128   ;;  %s1053_s29 = smov 8  }
 0x202   :  { %709 = dma.vmem_to_hbm [thread:$0]  %s704_s4, 4096, %s1363_s5, [#allocation3], %s1052_s28, %s1052_s28, %s1053_s29  }
 0x203   :  { %1049 = dma.done.wait [#allocation3], 4096  }
 0x204   :  { %1050 = vsyncadd [#allocation3], 4294963200 }
 0x205   :  { %713 = vsyncpa [#allocation3], 1 }

</bundles_post_ra>
